<compile_context>
chip_gen: v6e
topology: v6e:2x2x1
jax: 0.10.0
libtpu: 0.0.40
codegen_flags: <defaults>
</compile_context>

<pallas_src>
import jax
import jax.numpy as jnp
from jax.experimental import pallas as pl
from jax.experimental.pallas import tpu as pltpu


def _round_up(n, m):
    return ((n + m - 1) // m) * m


def _policy_kernel(x_ref, w1_ref, b1_ref, w2_ref, b2_ref, wm_ref, bm_ref,
                   mean_ref):
    # Transposed layout: x is (in_dim, batch_tile); all matmuls are W @ x so
    # the batch stays on the lane axis end-to-end (dense vst, dense vregs).
    x = x_ref[...]
    h1 = jnp.tanh(
        jnp.dot(w1_ref[...], x, preferred_element_type=jnp.float32)
        + b1_ref[...])
    h2 = jnp.tanh(
        jnp.dot(w2_ref[...], h1.astype(w2_ref.dtype),
                preferred_element_type=jnp.float32)
        + b2_ref[...])
    mean = (jnp.dot(wm_ref[...], h2.astype(wm_ref.dtype),
                    preferred_element_type=jnp.float32)
            + bm_ref[...])
    mean_ref[...] = mean.astype(mean_ref.dtype)


def policy_forward(x, params, *, batch_tile=512, matmul_dtype=jnp.float32):
    """Returns (action_mean, action_logstd), each (B, output_shape)."""
    w1, b1, w2, b2, wm, bm, logstd = params
    x = x.astype(jnp.float32)  # preprocess_obs_fn: cast obs to float tensor
    B, in_dim = x.shape
    h1_dim, _ = w1.shape          # (120, in_dim)
    h2_dim, _ = w2.shape          # (84, 120)
    out_dim, _ = wm.shape         # (output_shape, 84)

    # Batch lives on the lane axis -> tile must be a multiple of 128.
    tile = max(128, min(_round_up(batch_tile, 128), _round_up(B, 128)))
    B_pad = _round_up(B, tile)

    # Transpose to (in_dim, B) and pad batch (lane axis).
    x_t = x.T
    if B_pad != B:
        x_t = jnp.pad(x_t, ((0, 0), (0, B_pad - B)))

    # Optional bf16 MXU inputs (f32 accumulation stays inside the kernel).
    cast = lambda a: a.astype(matmul_dtype)
    x_t, w1c, w2c, wmc = cast(x_t), cast(w1), cast(w2), cast(wm)

    # Biases as (out, 1) columns: broadcast over lanes inside the kernel.
    b1c = b1.reshape(h1_dim, 1).astype(jnp.float32)
    b2c = b2.reshape(h2_dim, 1).astype(jnp.float32)
    bmc = bm.reshape(out_dim, 1).astype(jnp.float32)

    grid = (B_pad // tile,)
    full = lambda shape: pl.BlockSpec(shape, lambda i: (0, 0))

    mean_t = pl.pallas_call(
        _policy_kernel,
        out_shape=jax.ShapeDtypeStruct((out_dim, B_pad), jnp.float32),
        grid_spec=pltpu.PrefetchScalarGridSpec(
            num_scalar_prefetch=0,
            grid=grid,
            in_specs=[
                pl.BlockSpec((in_dim, tile), lambda i: (0, i)),  # x (in, B)
                full((h1_dim, in_dim)),    # w1
                full((h1_dim, 1)),         # b1
                full((h2_dim, h1_dim)),    # w2
                full((h2_dim, 1)),         # b2
                full((out_dim, h2_dim)),   # wm
                full((out_dim, 1)),        # bm
            ],
            out_specs=pl.BlockSpec((out_dim, tile), lambda i: (0, i)),
        ),
        compiler_params=pltpu.CompilerParams(
            dimension_semantics=("parallel",)),
    )(x_t, w1c, b1c, w2c, b2c, wmc, bmc)

    mean = mean_t.T[:B]
    # logstd is a learned (1, out_dim) parameter broadcast over batch -- pure
    # parameter broadcast, done outside the kernel (no compute, no extra DMA).
    action_logstd = jnp.broadcast_to(logstd.astype(jnp.float32), (B, out_dim))
    return mean, action_logstd


def init_params(key, input_shape, output_shape):
    """Deterministic init mimicking nn.Linear default (uniform +/- 1/sqrt(fan_in)).

    Weights are stored PyTorch-style (out_features, in_features)."""
    def linear(key, fan_in, fan_out):
        kw, kb = jax.random.split(key)
        bound = 1.0 / jnp.sqrt(fan_in)
        w = jax.random.uniform(kw, (fan_out, fan_in), jnp.float32, -bound, bound)
        b = jax.random.uniform(kb, (fan_out,), jnp.float32, -bound, bound)
        return w, b

    k1, k2, k3 = jax.random.split(key, 3)
    w1, b1 = linear(k1, input_shape, 120)
    w2, b2 = linear(k2, 120, 84)
    wm, bm = linear(k3, 84, output_shape)
    logstd = jnp.zeros((1, output_shape), jnp.float32)  # nn.Parameter(zeros)
    return (w1, b1, w2, b2, wm, bm, logstd)


def reference_forward(x, params):
    w1, b1, w2, b2, wm, bm, logstd = params
    x = x.astype(jnp.float32)
    h1 = jnp.tanh(x @ w1.T + b1)
    h2 = jnp.tanh(h1 @ w2.T + b2)
    mean = h2 @ wm.T + bm
    return mean, jnp.broadcast_to(logstd, mean.shape)


if __name__ == "__main__":
    key = jax.random.PRNGKey(0)
    kx, kx2, kp = jax.random.split(key, 3)

    input_shape = 16    # flattened observation dim (e.g. small Box obs space)
    output_shape = 4    # action dim

    params = init_params(kp, input_shape, output_shape)

    # --- small batch, f32 matmuls: tight check against pure-JAX reference ---
    batch = 2
    x = jax.random.normal(kx, (batch, input_shape), jnp.float32)
    mean, logstd = policy_forward(x, params)
    jax.block_until_ready((mean, logstd))
    ref_mean, ref_logstd = reference_forward(x, params)
    assert mean.shape == (batch, output_shape)
    assert logstd.shape == (batch, output_shape)
    assert jnp.allclose(mean, ref_mean, atol=1e-5, rtol=1e-5)
    assert jnp.allclose(logstd, ref_logstd, atol=1e-6)

    # --- larger batch: multi-step parallel grid (2 tiles of 512) ---
    batch2 = 1000
    x2 = jax.random.normal(kx2, (batch2, input_shape), jnp.float32)
    mean2, logstd2 = policy_forward(x2, params, batch_tile=512)
    jax.block_until_ready((mean2, logstd2))
    ref_mean2, ref_logstd2 = reference_forward(x2, params)
    assert mean2.shape == (batch2, output_shape)
    assert jnp.allclose(mean2, ref_mean2, atol=1e-5, rtol=1e-5)
    assert jnp.allclose(logstd2, ref_logstd2, atol=1e-6)

    # --- bf16 MXU inputs (f32 accumulation/bias/tanh): loose tolerance ---
    mean_bf, _ = policy_forward(x2, params, batch_tile=512,
                                matmul_dtype=jnp.bfloat16)
    jax.block_until_ready(mean_bf)
    assert jnp.allclose(mean_bf, ref_mean2, atol=3e-2, rtol=3e-2)

    print("KERNEL_OK")
</pallas_src>

<mosaic_0001>
module attributes {stable_mosaic.version = 11 : i64} {
  func.func @_policy_kernel(%arg0: i32, %arg1: memref<16x128xf32, #tpu.memory_space<vmem>>, %arg2: memref<120x16xf32, #tpu.memory_space<vmem>>, %arg3: memref<120x1xf32, #tpu.memory_space<vmem>>, %arg4: memref<84x120xf32, #tpu.memory_space<vmem>>, %arg5: memref<84x1xf32, #tpu.memory_space<vmem>>, %arg6: memref<4x84xf32, #tpu.memory_space<vmem>>, %arg7: memref<4x1xf32, #tpu.memory_space<vmem>>, %arg8: memref<4x128xf32, #tpu.memory_space<vmem>>) attributes {dimension_semantics = [#tpu.dimension_semantics<parallel>], iteration_bounds = array<i64: 1>, scalar_prefetch = 0 : i64, scratch_operands = 0 : i64, tpu.core_type = #tpu.core_type<tc>, window_params = [{transform_indices = @transform_0, window_bounds = array<i64: 16, 128>}, {pipeline_mode = #tpu.pipeline_mode<synchronous>, transform_indices = @transform_1, window_bounds = array<i64: 120, 16>}, {pipeline_mode = #tpu.pipeline_mode<synchronous>, transform_indices = @transform_2, window_bounds = array<i64: 120, 1>}, {pipeline_mode = #tpu.pipeline_mode<synchronous>, transform_indices = @transform_3, window_bounds = array<i64: 84, 120>}, {pipeline_mode = #tpu.pipeline_mode<synchronous>, transform_indices = @transform_4, window_bounds = array<i64: 84, 1>}, {pipeline_mode = #tpu.pipeline_mode<synchronous>, transform_indices = @transform_5, window_bounds = array<i64: 4, 84>}, {pipeline_mode = #tpu.pipeline_mode<synchronous>, transform_indices = @transform_6, window_bounds = array<i64: 4, 1>}, {transform_indices = @transform_7, window_bounds = array<i64: 4, 128>}]} {
    %c0 = arith.constant 0 : index
    %c0_0 = arith.constant 0 : index
    %0 = vector.load %arg1[%c0, %c0_0] : memref<16x128xf32, #tpu.memory_space<vmem>>, vector<16x128xf32>
    %c0_1 = arith.constant 0 : index
    %c0_2 = arith.constant 0 : index
    %1 = vector.load %arg2[%c0_1, %c0_2] : memref<120x16xf32, #tpu.memory_space<vmem>>, vector<120x16xf32>
    %cst = arith.constant dense<0.000000e+00> : vector<120x128xf32>
    %2 = tpu.matmul %1, %0, %cst {dimension_numbers = #tpu.dot_dimension_numbers<[1], [0], [0], [1], [0, 0, 1, 1], [], []>} : vector<120x16xf32>, vector<16x128xf32>, vector<120x128xf32> -> vector<120x128xf32>
    %c0_3 = arith.constant 0 : index
    %c0_4 = arith.constant 0 : index
    %3 = vector.load %arg3[%c0_3, %c0_4] : memref<120x1xf32, #tpu.memory_space<vmem>>, vector<120x1xf32>
    %4 = vector.broadcast %3 : vector<120x1xf32> to vector<120x128xf32>
    %5 = arith.addf %2, %4 : vector<120x128xf32>
    %6 = math.tanh %5 : vector<120x128xf32>
    %c0_5 = arith.constant 0 : index
    %c0_6 = arith.constant 0 : index
    %7 = vector.load %arg4[%c0_5, %c0_6] : memref<84x120xf32, #tpu.memory_space<vmem>>, vector<84x120xf32>
    %cst_7 = arith.constant dense<0.000000e+00> : vector<84x128xf32>
    %8 = tpu.matmul %7, %6, %cst_7 {dimension_numbers = #tpu.dot_dimension_numbers<[1], [0], [0], [1], [0, 0, 1, 1], [], []>} : vector<84x120xf32>, vector<120x128xf32>, vector<84x128xf32> -> vector<84x128xf32>
    %c0_8 = arith.constant 0 : index
    %c0_9 = arith.constant 0 : index
    %9 = vector.load %arg5[%c0_8, %c0_9] : memref<84x1xf32, #tpu.memory_space<vmem>>, vector<84x1xf32>
    %10 = vector.broadcast %9 : vector<84x1xf32> to vector<84x128xf32>
    %11 = arith.addf %8, %10 : vector<84x128xf32>
    %12 = math.tanh %11 : vector<84x128xf32>
    %c0_10 = arith.constant 0 : index
    %c0_11 = arith.constant 0 : index
    %13 = vector.load %arg6[%c0_10, %c0_11] : memref<4x84xf32, #tpu.memory_space<vmem>>, vector<4x84xf32>
    %cst_12 = arith.constant dense<0.000000e+00> : vector<4x128xf32>
    %14 = tpu.matmul %13, %12, %cst_12 {dimension_numbers = #tpu.dot_dimension_numbers<[1], [0], [0], [1], [0, 0, 1, 1], [], []>} : vector<4x84xf32>, vector<84x128xf32>, vector<4x128xf32> -> vector<4x128xf32>
    %c0_13 = arith.constant 0 : index
    %c0_14 = arith.constant 0 : index
    %15 = vector.load %arg7[%c0_13, %c0_14] : memref<4x1xf32, #tpu.memory_space<vmem>>, vector<4x1xf32>
    %16 = vector.broadcast %15 : vector<4x1xf32> to vector<4x128xf32>
    %17 = arith.addf %14, %16 : vector<4x128xf32>
    %c0_15 = arith.constant 0 : index
    %c0_16 = arith.constant 0 : index
    %18 = vector.load %arg8[%c0_15, %c0_16] : memref<4x128xf32, #tpu.memory_space<vmem>>, vector<4x128xf32>
    tpu.vector_store %arg8[%c0_15, %c0_16], %17 {strides = array<i32>} : memref<4x128xf32, #tpu.memory_space<vmem>>, vector<4x128xf32>,
    return
  }
  func.func @transform_0(%arg0: i32) -> (i32, i32) {
    %c0_i32 = arith.constant 0 : i32
    %c0_i32_0 = arith.constant 0 : i32
    return %c0_i32, %arg0 : i32, i32
  }
  func.func @transform_1(%arg0: i32) -> (i32, i32) {
    %c0_i32 = arith.constant 0 : i32
    %c0_i32_0 = arith.constant 0 : i32
    %c0_i32_1 = arith.constant 0 : i32
    return %c0_i32, %c0_i32_0 : i32, i32
  }
  func.func @transform_2(%arg0: i32) -> (i32, i32) {
    %c0_i32 = arith.constant 0 : i32
    %c0_i32_0 = arith.constant 0 : i32
    %c0_i32_1 = arith.constant 0 : i32
    return %c0_i32, %c0_i32_0 : i32, i32
  }
  func.func @transform_3(%arg0: i32) -> (i32, i32) {
    %c0_i32 = arith.constant 0 : i32
    %c0_i32_0 = arith.constant 0 : i32
    %c0_i32_1 = arith.constant 0 : i32
    return %c0_i32, %c0_i32_0 : i32, i32
  }
  func.func @transform_4(%arg0: i32) -> (i32, i32) {
    %c0_i32 = arith.constant 0 : i32
    %c0_i32_0 = arith.constant 0 : i32
    %c0_i32_1 = arith.constant 0 : i32
    return %c0_i32, %c0_i32_0 : i32, i32
  }
  func.func @transform_5(%arg0: i32) -> (i32, i32) {
    %c0_i32 = arith.constant 0 : i32
    %c0_i32_0 = arith.constant 0 : i32
    %c0_i32_1 = arith.constant 0 : i32
    return %c0_i32, %c0_i32_0 : i32, i32
  }
  func.func @transform_6(%arg0: i32) -> (i32, i32) {
    %c0_i32 = arith.constant 0 : i32
    %c0_i32_0 = arith.constant 0 : i32
    %c0_i32_1 = arith.constant 0 : i32
    return %c0_i32, %c0_i32_0 : i32, i32
  }
  func.func @transform_7(%arg0: i32) -> (i32, i32) {
    %c0_i32 = arith.constant 0 : i32
    %c0_i32_0 = arith.constant 0 : i32
    return %c0_i32, %arg0 : i32, i32
  }
}

</mosaic_0001>

<bundles_post_ra>
// kernel: tpu_custom_call.1
= control target key start
LH: loop header
LB: loop body
LE: loop exit
PB: predicated region body
PF: predicated region fallthrough
CT: control target
= control target key end

     0   :  { %v977_v1 = vmov 0.0   ;;  %vm978_vm0 = vmmov 0   ;;  %vm134_vm1 = vcmask 130048   ;;  %v979_v4 = vmov 0   ;;  %s1312_s0 = inlined_call_operand.vmem [shape: f32[16,128], index: 0, kind: input, shape index: {}]   ;;  %s1313_s1 = inlined_call_operand.vmem [shape: f32[120,16], index: 1, kind: input, shape index: {}]   ;;  %s1314_s2 = inlined_call_operand.vmem [shape: f32[120,1], index: 2, kind: input, shape index: {}]   ;;  %s1315_s3 = inlined_call_operand.vmem [shape: f32[84,120], index: 3, kind: input, shape index: {}]   ;;  %s1316_s4 = inlined_call_operand.vmem [shape: f32[84,1], index: 4, kind: input, shape index: {}]   ;;  %s1317_s5 = inlined_call_operand.vmem [shape: f32[4,84], index: 5, kind: input, shape index: {}]   ;;  %s1318_s6 = inlined_call_operand.vmem [shape: f32[4,1], index: 6, kind: input, shape index: {}]   ;;  %s1319_s7 = inlined_call_operand.hbm [shape: f32[4,128], index: 7, kind: output, shape index: {}]  }
   0x1   :  { %v28_v0 = vld [vmem:[%s1312_s0 + $0x8] sm:$0xff]  ;;  %760 = vmatprep.subr.mxu0 %v977_v1  ;;  %v27_v2 = vld [vmem:[%s1312_s0] sm:$0xff]  ;;  %764 = vmatprep.mubr.msk.f32.mxu0 %vm978_vm0, %v977_v1  ;;  %v58_v5 = vld [vmem:[%s1314_s2 + $0x70] sm:$0xff] }
   0x2   :  { %761 = vmatpush3.msra.mxu0 %v28_v0  ;;  %v29_v3 = vld [vmem:[%s1313_s1] sm:$0xff]  ;;  %901 = vset.pattern.permute.xlu0 %v979_v4  ;;  %v30_v7 = vld [vmem:[%s1313_s1 + $0x8] sm:$0xff]  ;;  %v55_v9 = vld [vmem:[%s1314_s2 + $0x58] sm:$0xff] }
   0x3   :  { %762 = vmatprep.subr.mxu0 %v977_v1  ;;  %902 = vset.pattern.permute.xlu1 %v979_v4  ;;  %v56_v6 = vld [vmem:[%s1314_s2 + $0x60] sm:$0xff]  ;;  %v57_v8 = vld [vmem:[%s1314_s2 + $0x68] sm:$0xff]  ;;  %v31_v10 = vld [vmem:[%s1313_s1 + $0x10] sm:$0xff] }
   0x4   :  { %763 = vmatpush3.msra.mxu0 %v27_v2  ;;  %809 = vmatprep.subr.mxu1 %v977_v1  ;;  %v54_v11 = vld [vmem:[%s1314_s2 + $0x50] sm:$0xff]  ;;  %v53_v12 = vld [vmem:[%s1314_s2 + $0x48] sm:$0xff]  ;;  %v32_v13 = vld [vmem:[%s1313_s1 + $0x18] sm:$0xff] }
   0x5   :  { %765 = vmatmul.mubr.msk.f32.vlgmr.msra.gmra.mxu0 %vm134_vm1, %v29_v3  ;;  %131 = vperm.xlu0 %901, %v58_v5   ;;  %v52_v14 = vld [vmem:[%s1314_s2 + $0x40] sm:$0xff] }
   0x6   :  { %767 = vmatprep.mubr.msk.f32.mxu0 %vm978_vm0, %v977_v1  ;;  %121 = vperm.xlu1 %902, %v56_v6  }
   0x7   :  { %839 = vmatprep.mubr.msk.f32.mxu1 %vm978_vm0, %v977_v1  ;;  %872 = vmatprep.subr.mxu0 %v977_v1 }
   0x9   :  { %768 = vmatmul.mubr.msk.f32.gmra.mxu0 %vm134_vm1, %v30_v7  ;;  %126 = vperm.xlu0 %901, %v57_v8  }
   0xa   :  { %770 = vmatprep.mubr.msk.f32.mxu0 %vm978_vm0, %v977_v1  ;;  %116 = vperm.xlu1 %902, %v55_v9  }
   0xd   :  { %771 = vmatmul.mubr.msk.f32.gmra.mxu0 %vm134_vm1, %v31_v10  ;;  %111 = vperm.xlu0 %901, %v54_v11  }
   0xe   :  { %773 = vmatprep.mubr.msk.f32.mxu0 %vm978_vm0, %v977_v1  ;;  %106 = vperm.xlu1 %902, %v53_v12  }
   0xf   :  { %12 = vsyncpa [#allocation3], 0  ;;  %v51_v15 = vld [vmem:[%s1314_s2 + $0x38] sm:$0xff]  ;;  %v33_v16 = vld [vmem:[%s1313_s1 + $0x20] sm:$0xff]  ;;  %vm412_vm2 = vcmask 982016   ;;  %vm588_vm3 = vcmask 1043456  }
  0x10   :  { %v50_v17 = vld [vmem:[%s1314_s2 + $0x30] sm:$0xff]  ;;  %v49_v18 = vld [vmem:[%s1314_s2 + $0x28] sm:$0xff]  ;;  %v48_v20 = vld [vmem:[%s1314_s2 + $0x20] sm:$0xff]  ;;  %vm584_vm4 = vcmask 687104   ;;  %s980_s9 = smov [#allocation2]  }
  0x11   :  { %774 = vmatmul.mubr.msk.f32.gmra.mxu0 %vm134_vm1, %v32_v13  ;;  %101 = vperm.xlu0 %901, %v52_v14   ;;  %v34_v19 = vld [vmem:[%s1313_s1 + $0x28] sm:$0xff]  ;;  %v47_v21 = vld [vmem:[%s1314_s2 + $0x18] sm:$0xff]  ;;  %v35_v22 = vld [vmem:[%s1313_s1 + $0x30] sm:$0xff]  ;;  %s669_s10 = sshll.u32 %s980_s9, 4  ;;  %s670_s10 = int_to_ptr.vmem [resolvable:$true] %s669_s10 }
  0x12   :  { %776 = vmatprep.mubr.msk.f32.mxu0 %vm978_vm0, %v977_v1  ;;  %96 = vperm.xlu1 %902, %v51_v15   ;;  %v46_v23 = vld [vmem:[%s1314_s2 + $0x10] sm:$0xff]  ;;  %v45_v24 = vld [vmem:[%s1314_s2 + $0x8] sm:$0xff]  ;;  %v36_v25 = vld [vmem:[%s1313_s1 + $0x38] sm:$0xff]  ;;  %s955_s11 = scalar_lea.vmem %s670_s10, 64  ;;  %p960_p1 = scmp.lt.s32.totalorder %s670_s10, %s670_s10 }
  0x13   :  { %v44_v26 = vld [vmem:[%s1314_s2] sm:$0xff]  ;;  %v356_v27 = vld [vmem:[%s1316_s4 + $0x50] sm:$0xf]  ;;  %v355_v29 = vld [vmem:[%s1316_s4 + $0x48] sm:$0xff]  ;;  %p956_p0 = scmp.ne.s32.totalorder %s670_s10, %s955_s11  ;;  %p961_p2 = scmp.lt.s32.totalorder %s955_s11, %s955_s11 }
  0x14   :  { %v37_v28 = vld [vmem:[%s1313_s1 + $0x40] sm:$0xff]  ;;  %v38_v31 = vld [vmem:[%s1313_s1 + $0x48] sm:$0xff]  ;;  %v353_v32 = vld [vmem:[%s1316_s4 + $0x38] sm:$0xff] }
  0x15   :  { %777 = vmatmul.mubr.msk.f32.gmra.mxu0 %vm134_vm1, %v33_v16  ;;  %91 = vperm.xlu0 %901, %v50_v17   ;;  %v354_v30 = vld [vmem:[%s1316_s4 + $0x40] sm:$0xff]  ;;  %v352_v33 = vld [vmem:[%s1316_s4 + $0x30] sm:$0xff]  ;;  %v351_v35 = vld [vmem:[%s1316_s4 + $0x28] sm:$0xff]  ;;  %p962_p3 = por %p961_p2, %p960_p1 }
  0x16   :  { %779 = vmatprep.mubr.msk.f32.mxu0 %vm978_vm0, %v977_v1  ;;  %86 = vperm.xlu1 %902, %v49_v18   ;;  %v39_v34 = vld [vmem:[%s1313_s1 + $0x50] sm:$0xff]  ;;  %v350_v36 = vld [vmem:[%s1316_s4 + $0x20] sm:$0xff]  ;;  %v40_v37 = vld [vmem:[%s1313_s1 + $0x58] sm:$0xff] }
  0x17   :  { %v349_v38 = vld [vmem:[%s1316_s4 + $0x18] sm:$0xff]  ;;  %v348_v39 = vld [vmem:[%s1316_s4 + $0x10] sm:$0xff]  ;;  %v41_v40 = vld [vmem:[%s1313_s1 + $0x60] sm:$0xff]  ;;  %p963_p4 = pnand %p962_p3, %p956_p0 }
  0x18   :  { %v347_v41 = vld [vmem:[%s1316_s4 + $0x8] sm:$0xff]  ;;  %v346_v42 = vld [vmem:[%s1316_s4] sm:$0xff]  ;;  %v43_v45 = vld [vmem:[%s1313_s1 + $0x70] sm:$0xff] }
  0x19   :  { %780 = vmatmul.mubr.msk.f32.gmra.mxu0 %vm134_vm1, %v34_v19  ;;  %81 = vperm.xlu0 %901, %v48_v20   ;;  %v42_v43 = vld [vmem:[%s1313_s1 + $0x68] sm:$0xff]  ;;  %v578_v44 = vld [vmem:[%s1318_s6] sm:$0xf] }
  0x1a   :  { %782 = vmatprep.mubr.msk.f32.mxu0 %vm978_vm0, %v977_v1  ;;  %76 = vperm.xlu1 %902, %v47_v21  }
  0x1d   :  { %783 = vmatmul.mubr.msk.f32.gmra.mxu0 %vm134_vm1, %v35_v22  ;;  %71 = vperm.xlu0 %901, %v46_v23  }
  0x1e   :  { %785 = vmatprep.mubr.msk.f32.mxu0 %vm978_vm0, %v977_v1  ;;  %66 = vperm.xlu1 %902, %v45_v24  }
  0x21   :  { %786 = vmatmul.mubr.msk.f32.gmra.mxu0 %vm134_vm1, %v36_v25  ;;  %61 = vperm.xlu0 %901, %v44_v26  }
  0x22   :  { %788 = vmatprep.mubr.msk.f32.mxu0 %vm978_vm0, %v977_v1  ;;  %409 = vperm.xlu1 %902, %v356_v27  }
  0x25   :  { %789 = vmatmul.mubr.msk.f32.gmra.mxu0 %vm134_vm1, %v37_v28  ;;  %404 = vperm.xlu0 %901, %v355_v29  }
  0x26   :  { %791 = vmatprep.mubr.msk.f32.mxu0 %vm978_vm0, %v977_v1  ;;  %399 = vperm.xlu1 %902, %v354_v30  }
  0x29   :  { %792 = vmatmul.mubr.msk.f32.gmra.mxu0 %vm134_vm1, %v38_v31  ;;  %394 = vperm.xlu0 %901, %v353_v32  }
  0x2a   :  { %794 = vmatprep.mubr.msk.f32.mxu0 %vm978_vm0, %v977_v1  ;;  %389 = vperm.xlu1 %902, %v352_v33  }
  0x2d   :  { %795 = vmatmul.mubr.msk.f32.gmra.mxu0 %vm134_vm1, %v39_v34  ;;  %384 = vperm.xlu0 %901, %v351_v35  }
  0x2e   :  { %797 = vmatprep.mubr.msk.f32.mxu0 %vm978_vm0, %v977_v1  ;;  %379 = vperm.xlu1 %902, %v350_v36  }
  0x31   :  { %798 = vmatmul.mubr.msk.f32.gmra.mxu0 %vm134_vm1, %v40_v37  ;;  %374 = vperm.xlu0 %901, %v349_v38  }
  0x32   :  { %800 = vmatprep.mubr.msk.f32.mxu0 %vm978_vm0, %v977_v1  ;;  %369 = vperm.xlu1 %902, %v348_v39  }
  0x35   :  { %801 = vmatmul.mubr.msk.f32.gmra.mxu0 %vm134_vm1, %v41_v40  ;;  %364 = vperm.xlu0 %901, %v347_v41  }
  0x36   :  { %803 = vmatprep.mubr.msk.f32.mxu0 %vm978_vm0, %v977_v1  ;;  %359 = vperm.xlu1 %902, %v346_v42  }
  0x39   :  { %804 = vmatmul.mubr.msk.f32.gmra.mxu0 %vm134_vm1, %v42_v43  ;;  %581 = vperm.xlu0 %901, %v578_v44  }
  0x3a   :  { %806 = vmatprep.mubr.msk.f32.mxu0 %vm978_vm0, %v977_v1 }
  0x3d   :  { %807 = vmatmul.mubr.msk.f32.gmra.mxu0 %vm134_vm1, %v43_v45 }
  0x3e   :  { %894 = vmatprep.mubr.msk.f32.mxu0 %vm978_vm0, %v977_v1 }
  0x80   :  { %v132_v2 = vpop.permute.xlu0 %131 }
  0x81   :  { %v122_v5 = vpop.permute.xlu1 %121 }
  0x84   :  { %v127_v7 = vpop.permute.xlu0 %126 }
  0x85   :  { %v117_v10 = vpop.permute.xlu1 %116 }
  0x88   :  { %v112_v12 = vpop.permute.xlu0 %111 }
  0x89   :  { %v107_v15 = vpop.permute.xlu1 %106 }
  0x8c   :  { %v102_v17 = vpop.permute.xlu0 %101 }
  0x8d   :  { %v97_v23 = vpop.permute.xlu1 %96 }
  0x90   :  { %v92_v25 = vpop.permute.xlu0 %91 }
  0x91   :  { %v87_v28 = vpop.permute.xlu1 %86 }
  0x94   :  { %v82_v30 = vpop.permute.xlu0 %81 }
  0x95   :  { %v77_v34 = vpop.permute.xlu1 %76 }
  0x98   :  { %v72_v37 = vpop.permute.xlu0 %71 }
  0x99   :  { %v67_v42 = vpop.permute.xlu1 %66 }
  0x9c   :  { %v62_v45 = vpop.permute.xlu0 %61 }
  0xc5   :  { %v1206_v46 = vpop.f32.mrf.mxu0 }
  0xc7   :  { %v766_v47 = vpop.f32.mrf.mxu0 }
  0xc9   :  { %v1208_v48 = vpop.f32.mrf.mxu0 }
  0xca   :  { %v252_v47 = vadd.f32 %v1208_v48, %v67_v42 }
  0xcb   :  { %v769_v49 = vpop.f32.mrf.mxu0 }
  0xcd   :  { %v1210_v50 = vpop.f32.mrf.mxu0 }
  0xce   :  { %v257_v43 = vadd.f32 %v1210_v50, %v72_v37 }
  0xcf   :  { %v772_v51 = vpop.f32.mrf.mxu0 }
  0xd0   :  { %v247_v51 = vadd.f32 %v1206_v46, %v62_v45 }
  0xd1   :  { %v1212_v52 = vpop.f32.mrf.mxu0 }
  0xd2   :  { %v262_v40 = vadd.f32 %v1212_v52, %v77_v34 }
  0xd3   :  { %v775_v53 = vpop.f32.mrf.mxu0 }
  0xd5   :  { %v266_v54 = vpop.f32.mrf.mxu0 }
  0xd6   :  { %v267_v38 = vadd.f32 %v266_v54, %v82_v30 }
  0xd7   :  { %v778_v55 = vpop.f32.mrf.mxu0 }
  0xd9   :  { %v271_v56 = vpop.f32.mrf.mxu0 }
  0xda   :  { %v272_v35 = vadd.f32 %v271_v56, %v87_v28 }
  0xdb   :  { %v781_v57 = vpop.f32.mrf.mxu0 }
  0xdc   :  { %v335_v57 = vld [vmem:[%s1315_s3] sm:$0xff] }
  0xdd   :  { %v276_v58 = vpop.f32.mrf.mxu0 }
  0xde   :  { %v277_v32 = vadd.f32 %v276_v58, %v92_v25 }
  0xdf   :  { %v784_v59 = vpop.f32.mrf.mxu0 }
  0xe0   :  { %v336_v59 = vld [vmem:[%s1315_s3 + $0x8] sm:$0xff] }
  0xe1   :  { %v281_v60 = vpop.f32.mrf.mxu0 }
  0xe2   :  { %v282_v31 = vadd.f32 %v281_v60, %v97_v23  ;;  %v337_v60 = vld [vmem:[%s1315_s3 + $0x10] sm:$0xff]  ;;  %v405_v23 = vpop.permute.xlu0 %404 }
  0xe3   :  { %v787_v61 = vpop.f32.mrf.mxu0 }
  0xe4   :  { %v338_v61 = vld [vmem:[%s1315_s3 + $0x18] sm:$0xff] }
  0xe5   :  { %v286_v62 = vpop.f32.mrf.mxu0 }
  0xe6   :  { %v287_v29 = vadd.f32 %v286_v62, %v102_v17  ;;  %v339_v62 = vld [vmem:[%s1315_s3 + $0x20] sm:$0xff]  ;;  %v395_v28 = vpop.permute.xlu0 %394 }
  0xe7   :  { %v790_v63 = vpop.f32.mrf.mxu0 }
  0xe8   :  { %v340_v63 = vld [vmem:[%s1315_s3 + $0x28] sm:$0xff] }
  0xe9   :  { %v291_v0 = vpop.f32.mrf.mxu0 }
  0xea   :  { %v292_v27 = vadd.f32 %v291_v0, %v107_v15  ;;  %v341_v0 = vld [vmem:[%s1315_s3 + $0x30] sm:$0xff] }
  0xeb   :  { %v793_v3 = vpop.f32.mrf.mxu0 }
  0xec   :  { %v343_v3 = vld [vmem:[%s1315_s3 + $0x40] sm:$0xff] }
  0xed   :  { %v296_v4 = vpop.f32.mrf.mxu0 }
  0xee   :  { %v297_v26 = vadd.f32 %v296_v4, %v112_v12  ;;  %v344_v4 = vld [vmem:[%s1315_s3 + $0x48] sm:$0xff] }
  0xef   :  { %v796_v6 = vpop.f32.mrf.mxu0 }
  0xf1   :  { %v301_v8 = vpop.f32.mrf.mxu0 }
  0xf2   :  { %v302_v24 = vadd.f32 %v301_v8, %v117_v10 }
  0xf3   :  { %v799_v9 = vpop.f32.mrf.mxu0 }
  0xf5   :  { %v306_v11 = vpop.f32.mrf.mxu0 }
  0xf6   :  { %v307_v22 = vadd.f32 %v306_v11, %v122_v5  ;;  %v345_v5 = vld [vmem:[%s1315_s3 + $0x50] sm:$0xf] }
  0xf7   :  { %v802_v13 = vpop.f32.mrf.mxu0 }
  0xf9   :  { %v311_v14 = vpop.f32.mrf.mxu0 }
  0xfa   :  { %v312_v19 = vadd.f32 %v311_v14, %v127_v7 }
  0xfb   :  { %v805_v16 = vpop.f32.mrf.mxu0 }
  0xfd   :  { %v316_v18 = vpop.f32.mrf.mxu0 }
  0xfe   :  { %v317_v20 = vadd.f32 %v316_v18, %v132_v2  ;;  %v342_v2 = vld [vmem:[%s1315_s3 + $0x38] sm:$0xff] }
  0xff   :  { %v808_v21 = vpop.f32.mrf.mxu0 }
 0x100   :  { %903 = vtanh.f32 %v317_v20  ;;  %v410_v20 = vpop.permute.xlu1 %409 }
 0x101   :  { %905 = vtanh.f32 %v312_v19 }
 0x102   :  { %907 = vtanh.f32 %v307_v22 }
 0x103   :  { %909 = vtanh.f32 %v302_v24 }
 0x104   :  { %911 = vtanh.f32 %v297_v26  ;;  %v400_v25 = vpop.permute.xlu1 %399 }
 0x105   :  { %913 = vtanh.f32 %v292_v27 }
 0x106   :  { %915 = vtanh.f32 %v287_v29 }
 0x107   :  { %917 = vtanh.f32 %v282_v31 }
 0x108   :  { %919 = vtanh.f32 %v277_v32  ;;  %v390_v30 = vpop.permute.xlu1 %389 }
 0x109   :  { %921 = vtanh.f32 %v272_v35 }
 0x10a   :  { %923 = vtanh.f32 %v267_v38 }
 0x10b   :  { %925 = vtanh.f32 %v262_v40 }
 0x10c   :  { %927 = vtanh.f32 %v257_v43  ;;  %v380_v38 = vpop.permute.xlu1 %379 }
 0x10d   :  { %v904_v33 = vpop.eup %903  ;;  %929 = vtanh.f32 %v252_v47 }
 0x10e   :  { %810 = vmatpush3.msra.mxu1 %v904_v33  ;;  %v906_v36 = vpop.eup %905  ;;  %931 = vtanh.f32 %v247_v51 }
 0x10f   :  { %811 = vmatprep.subr.mxu1 %v977_v1  ;;  %v908_v39 = vpop.eup %907 }
 0x110   :  { %812 = vmatpush3.msra.mxu1 %v906_v36  ;;  %v910_v41 = vpop.eup %909  ;;  %v385_v36 = vpop.permute.xlu0 %384 }
 0x111   :  { %813 = vmatprep.subr.mxu1 %v977_v1  ;;  %v912_v44 = vpop.eup %911  ;;  %v370_v43 = vpop.permute.xlu1 %369 }
 0x112   :  { %814 = vmatpush3.msra.mxu1 %v908_v39  ;;  %v914_v49 = vpop.eup %913 }
 0x113   :  { %815 = vmatprep.subr.mxu1 %v977_v1  ;;  %v916_v52 = vpop.eup %915 }
 0x114   :  { %816 = vmatpush3.msra.mxu1 %v910_v41  ;;  %v918_v50 = vpop.eup %917  ;;  %v375_v41 = vpop.permute.xlu0 %374 }
 0x115   :  { %817 = vmatprep.subr.mxu1 %v977_v1  ;;  %v920_v48 = vpop.eup %919 }
 0x116   :  { %818 = vmatpush3.msra.mxu1 %v912_v44  ;;  %v922_v53 = vpop.eup %921 }
 0x117   :  { %819 = vmatprep.subr.mxu1 %v977_v1  ;;  %v924_v46 = vpop.eup %923 }
 0x118   :  { %820 = vmatpush3.msra.mxu1 %v914_v49  ;;  %v926_v54 = vpop.eup %925  ;;  %v365_v49 = vpop.permute.xlu0 %364 }
 0x119   :  { %821 = vmatprep.subr.mxu1 %v977_v1  ;;  %v928_v55 = vpop.eup %927 }
 0x11a   :  { %822 = vmatpush3.msra.mxu1 %v916_v52  ;;  %v930_v56 = vpop.eup %929 }
 0x11b   :  { %823 = vmatprep.subr.mxu1 %v977_v1  ;;  %v932_v58 = vpop.eup %931 }
 0x11c   :  { %824 = vmatpush3.msra.mxu1 %v918_v50  ;;  %v360_v50 = vpop.permute.xlu1 %359 }
 0x11d   :  { %825 = vmatprep.subr.mxu1 %v977_v1 }
 0x11e   :  { %826 = vmatpush3.msra.mxu1 %v920_v48 }
 0x11f   :  { %827 = vmatprep.subr.mxu1 %v977_v1 }
 0x120   :  { %828 = vmatpush3.msra.mxu1 %v922_v53 }
 0x121   :  { %829 = vmatprep.subr.mxu1 %v977_v1 }
 0x122   :  { %830 = vmatpush3.msra.mxu1 %v924_v46 }
 0x123   :  { %831 = vmatprep.subr.mxu1 %v977_v1 }
 0x124   :  { %832 = vmatpush3.msra.mxu1 %v926_v54 }
 0x125   :  { %833 = vmatprep.subr.mxu1 %v977_v1 }
 0x126   :  { %834 = vmatpush3.msra.mxu1 %v928_v55 }
 0x127   :  { %835 = vmatprep.subr.mxu1 %v977_v1 }
 0x128   :  { %836 = vmatpush3.msra.mxu1 %v930_v56 }
 0x129   :  { %837 = vmatprep.subr.mxu1 %v977_v1 }
 0x12a   :  { %838 = vmatpush3.msra.mxu1 %v932_v58 }
 0x12b   :  { %840 = vmatmul.mubr.msk.f32.vlgmr.msra.gmra.mxu1 %vm412_vm2, %v335_v57 }
 0x12c   :  { %842 = vmatprep.mubr.msk.f32.mxu1 %vm978_vm0, %v977_v1 }
 0x12f   :  { %843 = vmatmul.mubr.msk.f32.gmra.mxu1 %vm412_vm2, %v336_v59 }
 0x130   :  { %845 = vmatprep.mubr.msk.f32.mxu1 %vm978_vm0, %v977_v1 }
 0x133   :  { %846 = vmatmul.mubr.msk.f32.gmra.mxu1 %vm412_vm2, %v337_v60  ;;  %v577_v60 = vld [vmem:[%s1317_s5] sm:$0xf] }
 0x134   :  { %848 = vmatprep.mubr.msk.f32.mxu1 %vm978_vm0, %v977_v1 }
 0x137   :  { %849 = vmatmul.mubr.msk.f32.gmra.mxu1 %vm412_vm2, %v338_v61 }
 0x138   :  { %851 = vmatprep.mubr.msk.f32.mxu1 %vm978_vm0, %v977_v1 }
 0x13b   :  { %852 = vmatmul.mubr.msk.f32.gmra.mxu1 %vm412_vm2, %v339_v62  ;;  %v582_v62 = vpop.permute.xlu0 %581 }
 0x13c   :  { %854 = vmatprep.mubr.msk.f32.mxu1 %vm978_vm0, %v977_v1 }
 0x13f   :  { %855 = vmatmul.mubr.msk.f32.gmra.mxu1 %vm412_vm2, %v340_v63 }
 0x140   :  { %857 = vmatprep.mubr.msk.f32.mxu1 %vm978_vm0, %v977_v1 }
 0x143   :  { %858 = vmatmul.mubr.msk.f32.gmra.mxu1 %vm412_vm2, %v341_v0 }
 0x144   :  { %860 = vmatprep.mubr.msk.f32.mxu1 %vm978_vm0, %v977_v1 }
 0x147   :  { %861 = vmatmul.mubr.msk.f32.gmra.mxu1 %vm412_vm2, %v342_v2 }
 0x148   :  { %863 = vmatprep.mubr.msk.f32.mxu1 %vm978_vm0, %v977_v1 }
 0x14b   :  { %864 = vmatmul.mubr.msk.f32.gmra.mxu1 %vm412_vm2, %v343_v3 }
 0x14c   :  { %866 = vmatprep.mubr.msk.f32.mxu1 %vm978_vm0, %v977_v1 }
 0x14f   :  { %867 = vmatmul.mubr.msk.f32.gmra.mxu1 %vm412_vm2, %v344_v4 }
 0x150   :  { %869 = vmatprep.mubr.msk.f32.mxu1 %vm978_vm0, %v977_v1 }
 0x153   :  { %870 = vmatmul.mubr.msk.f32.gmra.mxu1 %vm412_vm2, %v345_v5 }
 0x1eb   :  { %v512_v6 = vpop.f32.mrf.mxu1 }
 0x1ec   :  { %v513_v48 = vadd.f32 %v512_v6, %v360_v50 }
 0x1ed   :  { %v841_v7 = vpop.f32.mrf.mxu1 }
 0x1ef   :  { %v517_v8 = vpop.f32.mrf.mxu1 }
 0x1f0   :  { %v518_v51 = vadd.f32 %v517_v8, %v365_v49 }
 0x1f1   :  { %v844_v9 = vpop.f32.mrf.mxu1 }
 0x1f3   :  { %v522_v10 = vpop.f32.mrf.mxu1 }
 0x1f4   :  { %v523_v45 = vadd.f32 %v522_v10, %v370_v43 }
 0x1f5   :  { %v847_v11 = vpop.f32.mrf.mxu1 }
 0x1f7   :  { %v527_v12 = vpop.f32.mrf.mxu1 }
 0x1f8   :  { %v528_v44 = vadd.f32 %v527_v12, %v375_v41 }
 0x1f9   :  { %v850_v13 = vpop.f32.mrf.mxu1 }
 0x1fb   :  { %v532_v14 = vpop.f32.mrf.mxu1 }
 0x1fc   :  { %v533_v42 = vadd.f32 %v532_v14, %v380_v38 }
 0x1fd   :  { %v853_v15 = vpop.f32.mrf.mxu1 }
 0x1ff   :  { %v537_v16 = vpop.f32.mrf.mxu1 }
 0x200   :  { %v538_v40 = vadd.f32 %v537_v16, %v385_v36 }
 0x201   :  { %v856_v17 = vpop.f32.mrf.mxu1 }
 0x203   :  { %v542_v18 = vpop.f32.mrf.mxu1 }
 0x204   :  { %v543_v39 = vadd.f32 %v542_v18, %v390_v30 }
 0x205   :  { %v859_v19 = vpop.f32.mrf.mxu1 }
 0x207   :  { %v547_v21 = vpop.f32.mrf.mxu1 }
 0x208   :  { %v548_v37 = vadd.f32 %v547_v21, %v395_v28 }
 0x209   :  { %v862_v22 = vpop.f32.mrf.mxu1 }
 0x20b   :  { %v552_v24 = vpop.f32.mrf.mxu1 }
 0x20c   :  { %v553_v35 = vadd.f32 %v552_v24, %v400_v25 }
 0x20d   :  { %v865_v26 = vpop.f32.mrf.mxu1 }
 0x20f   :  { %v557_v27 = vpop.f32.mrf.mxu1 }
 0x210   :  { %v558_v32 = vadd.f32 %v557_v27, %v405_v23 }
 0x211   :  { %v868_v29 = vpop.f32.mrf.mxu1 }
 0x213   :  { %v562_v31 = vpop.f32.mrf.mxu1 }
 0x214   :  { %v563_v33 = vadd.f32 %v562_v31, %v410_v20 }
 0x215   :  { %v871_v34 = vpop.f32.mrf.mxu1 }
 0x216   :  { %933 = vtanh.f32 %v563_v33 }
 0x217   :  { %935 = vtanh.f32 %v558_v32 }
 0x218   :  { %937 = vtanh.f32 %v553_v35 }
 0x219   :  { %939 = vtanh.f32 %v548_v37 }
 0x21a   :  { %941 = vtanh.f32 %v543_v39 }
 0x21b   :  { %943 = vtanh.f32 %v538_v40 }
 0x21c   :  { %945 = vtanh.f32 %v533_v42 }
 0x21d   :  { %947 = vtanh.f32 %v528_v44 }
 0x21e   :  { %949 = vtanh.f32 %v523_v45 }
 0x21f   :  { %951 = vtanh.f32 %v518_v51 }
 0x220   :  { %953 = vtanh.f32 %v513_v48 }
 0x223   :  { %v934_v47 = vpop.eup %933 }
 0x224   :  { %873 = vmatpush3.msk.msra.mxu0 %vm588_vm3, %v934_v47  ;;  %v936_v52 = vpop.eup %935 }
 0x225   :  { %874 = vmatprep.subr.mxu0 %v977_v1  ;;  %v938_v53 = vpop.eup %937 }
 0x226   :  { %875 = vmatpush3.msra.mxu0 %v936_v52  ;;  %v940_v46 = vpop.eup %939 }
 0x227   :  { %876 = vmatprep.subr.mxu0 %v977_v1  ;;  %v942_v54 = vpop.eup %941 }
 0x228   :  { %877 = vmatpush3.msra.mxu0 %v938_v53  ;;  %v944_v55 = vpop.eup %943 }
 0x229   :  { %878 = vmatprep.subr.mxu0 %v977_v1  ;;  %v946_v56 = vpop.eup %945 }
 0x22a   :  { %879 = vmatpush3.msra.mxu0 %v940_v46  ;;  %v948_v57 = vpop.eup %947 }
 0x22b   :  { %880 = vmatprep.subr.mxu0 %v977_v1  ;;  %v950_v58 = vpop.eup %949 }
 0x22c   :  { %881 = vmatpush3.msra.mxu0 %v942_v54  ;;  %v952_v59 = vpop.eup %951 }
 0x22d   :  { %882 = vmatprep.subr.mxu0 %v977_v1  ;;  %v954_v61 = vpop.eup %953 }
 0x22e   :  { %883 = vmatpush3.msra.mxu0 %v944_v55 }
 0x22f   :  { %884 = vmatprep.subr.mxu0 %v977_v1 }
 0x230   :  { %885 = vmatpush3.msra.mxu0 %v946_v56 }
 0x231   :  { %886 = vmatprep.subr.mxu0 %v977_v1 }
 0x232   :  { %887 = vmatpush3.msra.mxu0 %v948_v57 }
 0x233   :  { %888 = vmatprep.subr.mxu0 %v977_v1 }
 0x234   :  { %889 = vmatpush3.msra.mxu0 %v950_v58 }
 0x235   :  { %890 = vmatprep.subr.mxu0 %v977_v1 }
 0x236   :  { %891 = vmatpush3.msra.mxu0 %v952_v59 }
 0x237   :  { %892 = vmatprep.subr.mxu0 %v977_v1 }
 0x238   :  { %893 = vmatpush3.msra.mxu0 %v954_v61 }
 0x239   :  { %895 = vmatmul.mubr.msk.f32.vlgmr.msra.gmra.mxu0 %vm584_vm4, %v577_v60 }
 0x2f9   :  { %v658_v63 = vpop.f32.mrf.mxu0 }
 0x2fa   :  { %v659_v0 = vadd.f32 %v658_v63, %v582_v62 }
 0x2fb   :  { %v896_v2 = vpop.f32.mrf.mxu0 }
 0x2fc   :  { %662 = vst [vmem:[#allocation2] sm:$0xf] %v659_v0 }
 0x2fd   :  { %966 = shalt.err (!%p963_p4)
}
 0x2fe   :  { %672 = dma.vmem_to_hbm [thread:$0]  %s670_s10, 64, %s1319_s7, [#allocation3]  }
 0x2ff   :  { %975 = dma.done.wait [#allocation3], 64  }
 0x300   :  { %976 = vsyncadd [#allocation3], 4294967232 }
 0x301   :  { %676 = vsyncpa [#allocation3], 1 }

</bundles_post_ra>
